<compile_context>
chip_gen: v5e
topology: v5e:2x2
jax: 0.10.0
libtpu: 0.0.40
codegen_flags: <defaults>
</compile_context>

<pallas_src>
import jax
import jax.numpy as jnp
from jax import lax
from jax.experimental import pallas as pl
from jax.experimental.pallas import tpu as pltpu

BN_EPS = 1e-5
LANE = 128


def _round_up(x, m):
    return (x + m - 1) // m * m


def _pad2(x, rows, cols):
    return jnp.pad(x, ((0, rows - x.shape[0]), (0, cols - x.shape[1])))


def _vmem_limit_bytes():
    """Generation-aware scoped-VMEM budget: ~half of physical VMEM, capped at
    64 MiB -> 64 MiB on v5e/v6e (128 MiB physical), 32 MiB on v7x (64 MiB)."""
    cap = 128 * 1024 * 1024
    try:
        cap = int(getattr(pltpu.get_tpu_info(), "vmem_capacity_bytes", cap))
    except Exception:
        pass
    return max(32 * 1024 * 1024, min(cap // 2, 64 * 1024 * 1024))


_VMEM_LIMIT = _vmem_limit_bytes()


# ------------------------------ tiling policy --------------------------------

def _plan_agg(b, n):
    """Pick (graphs-per-step G, adjacency row tile TILE_N) for kernel 1."""
    adj_budget = 2 * 1024 * 1024           # bf16 elems (~4 MiB) per adjacency buffer
    tile_n = n
    if n * n > adj_budget:                 # large graphs: tile the rows of `a`
        tile_n = 8
        d = 8
        while d <= n:
            if n % d == 0 and d * n <= adj_budget:
                tile_n = d
            d += 8
    g = 1                                  # small graphs: batch G graphs per step
    for cand in range(1, b + 1):
        if b % cand == 0 and cand * tile_n <= 1024 and cand * tile_n * n <= 2 * adj_budget:
            g = cand
    return g, tile_n


def _pick_row_tile(rows):
    """Row tile for the streaming MLP kernels (rows is a multiple of 8)."""
    if rows <= 1024:
        return rows
    for d in range(1024, 15, -16):         # prefer sublane-packed bf16 tiles
        if rows % d == 0:
            return d
    for d in range(1024, 7, -8):
        if rows % d == 0:
            return d
    # TODO(synk): for pathological row counts (8 * large prime) pad rows to a
    # multiple of 512 and mask the padded rows out of the BN statistics.
    return 8


# ----------------------------- kernel bodies ---------------------------------

def _agg_linear1_kernel(a_ref, v_ref, w1_ref, b1_ref, h1_ref, st_ref):
    """G graphs x TILE_N rows: h1 = ((a + eps*I) @ v) @ W1 + b1 (bf16 out),
    plus BN1 partial stats (sum / sum-of-squares of the bf16-rounded h1)."""
    # GIN aggregation on the MXU, f32 accumulation (eps already folded into a).
    agg = jnp.einsum("gij,gjc->gic", a_ref[...], v_ref[...],
                     preferred_element_type=jnp.float32)          # (G, TN, Cin_p)
    g, tn, c = agg.shape
    x = agg.reshape(g * tn, c)                                    # sublane-aligned
    h1 = jnp.dot(x.astype(jnp.bfloat16), w1_ref[...],
                 preferred_element_type=jnp.float32) + b1_ref[...]
    # Stats on the bf16-rounded values that stage 2 will actually consume.
    h1f = h1.astype(jnp.bfloat16).astype(jnp.float32)
    st_ref[0] = jnp.concatenate(
        [jnp.sum(h1f, axis=0, keepdims=True),
         jnp.sum(h1f * h1f, axis=0, keepdims=True)], axis=0)
    h1_ref[...] = h1.reshape(g, tn, -1).astype(jnp.bfloat16)


def _bn1_relu_linear2_kernel(h1_ref, scale1_ref, shift1_ref, w2_ref, b2_ref,
                             h2_ref, st_ref):
    """Row tile: h2 = ReLU(BN1(h1)) @ W2 + b2 (bf16 out), plus BN2 partial stats."""
    h = jnp.maximum(h1_ref[...].astype(jnp.float32) * scale1_ref[...]
                    + shift1_ref[...], 0.0)
    h2 = jnp.dot(h.astype(jnp.bfloat16), w2_ref[...],
                 preferred_element_type=jnp.float32) + b2_ref[...]
    h2f = h2.astype(jnp.bfloat16).astype(jnp.float32)
    st_ref[0] = jnp.concatenate(
        [jnp.sum(h2f, axis=0, keepdims=True),
         jnp.sum(h2f * h2f, axis=0, keepdims=True)], axis=0)
    h2_ref[...] = h2.astype(jnp.bfloat16)


def _bn2_relu_kernel(h2_ref, scale2_ref, shift2_ref, o_ref):
    o_ref[...] = jnp.maximum(h2_ref[...].astype(jnp.float32) * scale2_ref[...]
                             + shift2_ref[...], 0.0)


# ------------------------------- wrapper --------------------------------------

def _bn_fold(sum_v, sumsq_v, count, gamma, beta):
    """Training-mode BN (biased var) folded into per-channel scale/shift."""
    mean = sum_v / count
    var = jnp.maximum(sumsq_v / count - mean * mean, 0.0)
    g_inv = gamma * lax.rsqrt(var + BN_EPS)
    return g_inv[None, :], (beta - mean * g_inv)[None, :]


@jax.jit
def layer_gin_forward(v, a, params):
    """v: (B, N, C_in) f32, a: (B, N, N) f32 -> (B, N, C_out) f32."""
    b, n, c_in = v.shape
    hid = params["w1"].shape[1]
    c_out = params["w2"].shape[1]
    rows = b * n
    assert n % 8 == 0, "node count must be a multiple of 8 (sublane tiling)"

    cin_p = _round_up(c_in, LANE)
    hid_p = _round_up(hid, LANE)
    out_p = _round_up(c_out, LANE)

    g, tile_n = _plan_agg(b, n)
    ng, nj = b // g, n // tile_n
    tile_r = _pick_row_tile(rows)
    n_tiles = rows // tile_r

    # ---- host-side prep: fold eps into adjacency, lane-pad channels, cast bf16
    eps = params["epsilon"][0, 0]
    a_bf = (a + eps * jnp.eye(n, dtype=a.dtype)).astype(jnp.bfloat16)
    v_bf = jnp.pad(v, ((0, 0), (0, 0), (0, cin_p - c_in))).astype(jnp.bfloat16)
    w1_bf = _pad2(params["w1"], cin_p, hid_p).astype(jnp.bfloat16)
    b1_p = _pad2(params["b1"], 1, hid_p)
    w2_bf = _pad2(params["w2"], hid_p, out_p).astype(jnp.bfloat16)
    b2_p = _pad2(params["b2"], 1, out_p)
    g1 = _pad2(params["gamma1"], 1, hid_p)[0]
    be1 = _pad2(params["beta1"], 1, hid_p)[0]
    g2 = _pad2(params["gamma2"], 1, out_p)[0]
    be2 = _pad2(params["beta2"], 1, out_p)[0]

    cp_grid2 = pltpu.CompilerParams(dimension_semantics=("parallel", "parallel"),
                                    vmem_limit_bytes=_VMEM_LIMIT)
    cp_grid1 = pltpu.CompilerParams(dimension_semantics=("parallel",),
                                    vmem_limit_bytes=_VMEM_LIMIT)

    # ---- kernel 1: aggregation + Linear1 (+ BN1 partial stats) --------------
    # TODO(synk): if hidden/output dims ever reach ~2048+, add a K-tiling
    # "arbitrary" grid axis for w1/w2 with an accumulator scratch instead of
    # keeping the full weight resident in VMEM.
    ce1 = pl.CostEstimate(
        flops=2 * b * n * n * cin_p + 2 * rows * cin_p * hid_p + 4 * rows * hid_p,
        transcendentals=0,
        bytes_accessed=(b * n * n * 2 + b * n * cin_p * 2 + cin_p * hid_p * 2
                        + hid_p * 4 + rows * hid_p * 2 + ng * nj * 2 * hid_p * 4))
    h1, st1 = pl.pallas_call(
        _agg_linear1_kernel,
        out_shape=(jax.ShapeDtypeStruct((b, n, hid_p), jnp.bfloat16),
                   jax.ShapeDtypeStruct((ng * nj, 2, hid_p), jnp.float32)),
        grid=(ng, nj),
        in_specs=[
            pl.BlockSpec((g, tile_n, n), lambda i, j: (i, j, 0)),      # adjacency
            pl.BlockSpec((g, n, cin_p), lambda i, j: (i, 0, 0)),       # node feats
            pl.BlockSpec((cin_p, hid_p), lambda i, j: (0, 0)),         # W1 (resident)
            pl.BlockSpec((1, hid_p), lambda i, j: (0, 0)),             # b1
        ],
        out_specs=(
            pl.BlockSpec((g, tile_n, hid_p), lambda i, j: (i, j, 0)),
            pl.BlockSpec((1, 2, hid_p), lambda i, j: (i * nj + j, 0, 0)),
        ),
        compiler_params=cp_grid2,
        cost_estimate=ce1,
    )(a_bf, v_bf, w1_bf, b1_p)

    st1_tot = jnp.sum(st1, axis=0)
    scale1, shift1 = _bn_fold(st1_tot[0], st1_tot[1], rows, g1, be1)

    # ---- kernel 2: folded BN1 + ReLU + Linear2 (+ BN2 partial stats) --------
    h1_flat = h1.reshape(rows, hid_p)
    ce2 = pl.CostEstimate(
        flops=3 * rows * hid_p + 2 * rows * hid_p * out_p + 5 * rows * out_p,
        transcendentals=0,
        bytes_accessed=(rows * hid_p * 2 + 2 * hid_p * 4 + hid_p * out_p * 2
                        + out_p * 4 + rows * out_p * 2 + n_tiles * 2 * out_p * 4))
    h2, st2 = pl.pallas_call(
        _bn1_relu_linear2_kernel,
        out_shape=(jax.ShapeDtypeStruct((rows, out_p), jnp.bfloat16),
                   jax.ShapeDtypeStruct((n_tiles, 2, out_p), jnp.float32)),
        grid=(n_tiles,),
        in_specs=[
            pl.BlockSpec((tile_r, hid_p), lambda i: (i, 0)),
            pl.BlockSpec((1, hid_p), lambda i: (0, 0)),
            pl.BlockSpec((1, hid_p), lambda i: (0, 0)),
            pl.BlockSpec((hid_p, out_p), lambda i: (0, 0)),
            pl.BlockSpec((1, out_p), lambda i: (0, 0)),
        ],
        out_specs=(
            pl.BlockSpec((tile_r, out_p), lambda i: (i, 0)),
            pl.BlockSpec((1, 2, out_p), lambda i: (i, 0, 0)),
        ),
        compiler_params=cp_grid1,
        cost_estimate=ce2,
    )(h1_flat, scale1, shift1, w2_bf, b2_p)

    st2_tot = jnp.sum(st2, axis=0)
    scale2, shift2 = _bn_fold(st2_tot[0], st2_tot[1], rows, g2, be2)

    # ---- kernel 3: folded BN2 + ReLU -> output --------------------------------
    ce3 = pl.CostEstimate(
        flops=3 * rows * out_p,
        transcendentals=0,
        bytes_accessed=rows * out_p * 2 + 2 * out_p * 4 + rows * out_p * 4)
    out_flat = pl.pallas_call(
        _bn2_relu_kernel,
        out_shape=jax.ShapeDtypeStruct((rows, out_p), jnp.float32),
        grid=(n_tiles,),
        in_specs=[
            pl.BlockSpec((tile_r, out_p), lambda i: (i, 0)),
            pl.BlockSpec((1, out_p), lambda i: (0, 0)),
            pl.BlockSpec((1, out_p), lambda i: (0, 0)),
        ],
        out_specs=pl.BlockSpec((tile_r, out_p), lambda i: (i, 0)),
        compiler_params=cp_grid1,
        cost_estimate=ce3,
    )(h2, scale2, shift2)

    # strip channel padding, rearrange '(b n) c -> b n c'
    return out_flat[:, :c_out].reshape(b, n, c_out)


# --------------------------- params & reference ------------------------------

def init_params(key, input_dim, hidden_dim, output_dim):
    """Deterministic synthetic 'trained' parameters (Linear weights pre-transposed)."""
    k = jax.random.split(key, 8)
    return dict(
        epsilon=jnp.full((1, 1), 0.25, jnp.float32),   # nonzero to exercise eps path
        w1=(0.1 * jax.random.normal(k[0], (input_dim, hidden_dim))).astype(jnp.float32),
        b1=(0.1 * jax.random.normal(k[1], (1, hidden_dim))).astype(jnp.float32),
        gamma1=(1.0 + 0.1 * jax.random.normal(k[2], (1, hidden_dim))).astype(jnp.float32),
        beta1=(0.1 * jax.random.normal(k[3], (1, hidden_dim))).astype(jnp.float32),
        w2=(0.1 * jax.random.normal(k[4], (hidden_dim, output_dim))).astype(jnp.float32),
        b2=(0.1 * jax.random.normal(k[5], (1, output_dim))).astype(jnp.float32),
        gamma2=(1.0 + 0.1 * jax.random.normal(k[6], (1, output_dim))).astype(jnp.float32),
        beta2=(0.1 * jax.random.normal(k[7], (1, output_dim))).astype(jnp.float32),
    )


def _reference(v, a, p, *, kernel_matched):
    """Pure-JAX forward of the PyTorch module (training-mode BN).

    kernel_matched=True mirrors the kernel's bf16 matmul operands and bf16
    intermediate storage (f32 accumulation) for a tight comparison; False is
    the full-f32 module semantics."""
    b, n, _ = v.shape
    eps = p["epsilon"][0, 0]

    if kernel_matched:
        def mm(x): return x.astype(jnp.bfloat16)
        def rnd(x): return x.astype(jnp.bfloat16).astype(jnp.float32)
    else:
        def mm(x): return x
        def rnd(x): return x

    a_eps = a + eps * jnp.eye(n, dtype=a.dtype)
    agg = jnp.einsum("bij,bjc->bic", mm(a_eps), mm(v),
                     preferred_element_type=jnp.float32)
    x = agg.reshape(b * n, -1)

    h = jnp.dot(mm(x), mm(p["w1"]), preferred_element_type=jnp.float32) + p["b1"]
    h = rnd(h)
    m1, v1 = jnp.mean(h, 0, keepdims=True), jnp.var(h, 0, keepdims=True)
    h = jnp.maximum((h - m1) * lax.rsqrt(v1 + BN_EPS) * p["gamma1"] + p["beta1"], 0.0)

    h2 = jnp.dot(mm(h), mm(p["w2"]), preferred_element_type=jnp.float32) + p["b2"]
    h2 = rnd(h2)
    m2, v2 = jnp.mean(h2, 0, keepdims=True), jnp.var(h2, 0, keepdims=True)
    h2 = jnp.maximum((h2 - m2) * lax.rsqrt(v2 + BN_EPS) * p["gamma2"] + p["beta2"], 0.0)
    return h2.reshape(b, n, -1)


if __name__ == "__main__":
    B, N = 2, 8
    INPUT_DIM, HIDDEN_DIM, OUTPUT_DIM = 16, 32, 32

    key = jax.random.PRNGKey(0)
    kv, ka, kp = jax.random.split(key, 3)

    v = jax.random.normal(kv, (B, N, INPUT_DIM), dtype=jnp.float32)
    a = (jax.random.uniform(ka, (B, N, N)) > 0.5).astype(jnp.float32)
    params = init_params(kp, INPUT_DIM, HIDDEN_DIM, OUTPUT_DIM)

    out = layer_gin_forward(v, a, params)
    out = jax.block_until_ready(out)
    assert out.shape == (B, N, OUTPUT_DIM)

    # Tight check vs a reference mirroring bf16 matmuls + bf16 intermediates.
    ref_matched = _reference(v, a, params, kernel_matched=True)
    max_err = float(jnp.max(jnp.abs(out - ref_matched)))
    assert jnp.allclose(out, ref_matched, atol=1e-2, rtol=1e-2), max_err

    # Loose sanity check vs the full-f32 module semantics (bf16 rounding only).
    ref_f32 = _reference(v, a, params, kernel_matched=False)
    assert jnp.allclose(out, ref_f32, atol=1e-1, rtol=1e-1)

    print("KERNEL_OK")
</pallas_src>

<mosaic_0001>
module attributes {stable_mosaic.version = 11 : i64} {
  func.func @_agg_linear1_kernel(%arg0: i32, %arg1: i32, %arg2: memref<2x8x8xbf16, #tpu.memory_space<vmem>>, %arg3: memref<2x8x128xbf16, #tpu.memory_space<vmem>>, %arg4: memref<128x128xbf16, #tpu.memory_space<vmem>>, %arg5: memref<1x128xf32, #tpu.memory_space<vmem>>, %arg6: memref<2x8x128xbf16, #tpu.memory_space<vmem>>, %arg7: memref<1x2x128xf32, #tpu.memory_space<vmem>>) attributes {dimension_semantics = [#tpu.dimension_semantics<parallel>, #tpu.dimension_semantics<parallel>], iteration_bounds = array<i64: 1, 1>, scalar_prefetch = 0 : i64, scratch_operands = 0 : i64, tpu.core_type = #tpu.core_type<tc>, window_params = [{transform_indices = @transform_0, window_bounds = array<i64: 2, 8, 8>}, {transform_indices = @transform_1, window_bounds = array<i64: 2, 8, 128>}, {pipeline_mode = #tpu.pipeline_mode<synchronous>, transform_indices = @transform_2, window_bounds = array<i64: 128, 128>}, {pipeline_mode = #tpu.pipeline_mode<synchronous>, transform_indices = @transform_3, window_bounds = array<i64: 1, 128>}, {transform_indices = @transform_4, window_bounds = array<i64: 2, 8, 128>}, {transform_indices = @transform_5, window_bounds = array<i64: 1, 2, 128>}]} {
    %c0 = arith.constant 0 : index
    %c0_0 = arith.constant 0 : index
    %c0_1 = arith.constant 0 : index
    %0 = vector.load %arg2[%c0, %c0_0, %c0_1] : memref<2x8x8xbf16, #tpu.memory_space<vmem>>, vector<2x8x8xbf16>
    %c0_2 = arith.constant 0 : index
    %c0_3 = arith.constant 0 : index
    %c0_4 = arith.constant 0 : index
    %1 = vector.load %arg3[%c0_2, %c0_3, %c0_4] : memref<2x8x128xbf16, #tpu.memory_space<vmem>>, vector<2x8x128xbf16>
    "tpu.trace_start"() <{level = 10 : i32, message = "gij,gjc->gic"}> : () -> ()
    %cst = arith.constant dense<0.000000e+00> : vector<2x8x128xf32>
    %2 = tpu.matmul %0, %1, %cst {dimension_numbers = #tpu.dot_dimension_numbers<[2], [1], [1], [2], [0, 0, 0, 1, 1, 2], [0], [0]>} : vector<2x8x8xbf16>, vector<2x8x128xbf16>, vector<2x8x128xf32> -> vector<2x8x128xf32>
    "tpu.trace_stop"() : () -> ()
    %3 = vector.shape_cast %2 : vector<2x8x128xf32> to vector<16x128xf32>
    %4 = arith.truncf %3 : vector<16x128xf32> to vector<16x128xbf16>
    %c0_5 = arith.constant 0 : index
    %c0_6 = arith.constant 0 : index
    %5 = vector.load %arg4[%c0_5, %c0_6] : memref<128x128xbf16, #tpu.memory_space<vmem>>, vector<128x128xbf16>
    %cst_7 = arith.constant dense<0.000000e+00> : vector<16x128xf32>
    %6 = tpu.matmul %4, %5, %cst_7 {dimension_numbers = #tpu.dot_dimension_numbers<[1], [0], [0], [1], [0, 0, 1, 1], [], []>} : vector<16x128xbf16>, vector<128x128xbf16>, vector<16x128xf32> -> vector<16x128xf32>
    %c0_8 = arith.constant 0 : index
    %c0_9 = arith.constant 0 : index
    %7 = vector.load %arg5[%c0_8, %c0_9] : memref<1x128xf32, #tpu.memory_space<vmem>>, vector<1x128xf32>
    %8 = vector.broadcast %7 : vector<1x128xf32> to vector<16x128xf32>
    %9 = arith.addf %6, %8 : vector<16x128xf32>
    %10 = arith.truncf %9 : vector<16x128xf32> to vector<16x128xbf16>
    %11 = arith.extf %10 : vector<16x128xbf16> to vector<16x128xf32>
    %cst_10 = arith.constant dense<0.000000e+00> : vector<128xf32>
    %12 = vector.multi_reduction <add>, %11, %cst_10 [0] : vector<16x128xf32> to vector<128xf32>
    %13 = vector.shape_cast %12 : vector<128xf32> to vector<1x128xf32>
    %14 = arith.mulf %11, %11 : vector<16x128xf32>
    %cst_11 = arith.constant dense<0.000000e+00> : vector<128xf32>
    %15 = vector.multi_reduction <add>, %14, %cst_11 [0] : vector<16x128xf32> to vector<128xf32>
    %16 = vector.shape_cast %15 : vector<128xf32> to vector<1x128xf32>
    %17 = tpu.concatenate %13, %16 in 0 : vector<1x128xf32>, vector<1x128xf32> -> vector<2x128xf32>
    %c0_12 = arith.constant 0 : index
    %c0_13 = arith.constant 0 : index
    %c0_14 = arith.constant 0 : index
    %18 = vector.load %arg7[%c0_12, %c0_13, %c0_14] : memref<1x2x128xf32, #tpu.memory_space<vmem>>, vector<1x2x128xf32>
    %19 = vector.shape_cast %18 : vector<1x2x128xf32> to vector<2x128xf32>
    %20 = vector.shape_cast %17 : vector<2x128xf32> to vector<1x2x128xf32>
    tpu.vector_store %arg7[%c0_12, %c0_13, %c0_14], %20 {strides = array<i32>} : memref<1x2x128xf32, #tpu.memory_space<vmem>>, vector<1x2x128xf32>,
    %21 = vector.shape_cast %9 : vector<16x128xf32> to vector<2x8x128xf32>
    %22 = arith.truncf %21 : vector<2x8x128xf32> to vector<2x8x128xbf16>
    %c0_15 = arith.constant 0 : index
    %c0_16 = arith.constant 0 : index
    %c0_17 = arith.constant 0 : index
    %23 = vector.load %arg6[%c0_15, %c0_16, %c0_17] : memref<2x8x128xbf16, #tpu.memory_space<vmem>>, vector<2x8x128xbf16>
    tpu.vector_store %arg6[%c0_15, %c0_16, %c0_17], %22 {strides = array<i32>} : memref<2x8x128xbf16, #tpu.memory_space<vmem>>, vector<2x8x128xbf16>,
    return
  }
  func.func @transform_0(%arg0: i32, %arg1: i32) -> (i32, i32, i32) {
    %c0_i32 = arith.constant 0 : i32
    %c0_i32_0 = arith.constant 0 : i32
    return %arg0, %arg1, %c0_i32 : i32, i32, i32
  }
  func.func @transform_1(%arg0: i32, %arg1: i32) -> (i32, i32, i32) {
    %c0_i32 = arith.constant 0 : i32
    %c0_i32_0 = arith.constant 0 : i32
    %c0_i32_1 = arith.constant 0 : i32
    return %arg0, %c0_i32, %c0_i32_0 : i32, i32, i32
  }
  func.func @transform_2(%arg0: i32, %arg1: i32) -> (i32, i32) {
    %c0_i32 = arith.constant 0 : i32
    %c0_i32_0 = arith.constant 0 : i32
    %c0_i32_1 = arith.constant 0 : i32
    return %c0_i32, %c0_i32_0 : i32, i32
  }
  func.func @transform_3(%arg0: i32, %arg1: i32) -> (i32, i32) {
    %c0_i32 = arith.constant 0 : i32
    %c0_i32_0 = arith.constant 0 : i32
    %c0_i32_1 = arith.constant 0 : i32
    return %c0_i32, %c0_i32_0 : i32, i32
  }
  func.func @transform_4(%arg0: i32, %arg1: i32) -> (i32, i32, i32) {
    %c0_i32 = arith.constant 0 : i32
    %c0_i32_0 = arith.constant 0 : i32
    return %arg0, %arg1, %c0_i32 : i32, i32, i32
  }
  func.func @transform_5(%arg0: i32, %arg1: i32) -> (i32, i32, i32) {
    %c1_i32 = arith.constant 1 : i32
    %0 = arith.muli %arg0, %c1_i32 : i32
    %1 = arith.addi %0, %arg1 : i32
    %c0_i32 = arith.constant 0 : i32
    %c0_i32_0 = arith.constant 0 : i32
    %c0_i32_1 = arith.constant 0 : i32
    return %1, %c0_i32, %c0_i32_0 : i32, i32, i32
  }
}

module attributes {stable_mosaic.version = 11 : i64} {
  func.func @_bn1_relu_linear2_kernel(%arg0: i32, %arg1: memref<16x128xbf16, #tpu.memory_space<vmem>>, %arg2: memref<1x128xf32, #tpu.memory_space<vmem>>, %arg3: memref<1x128xf32, #tpu.memory_space<vmem>>, %arg4: memref<128x128xbf16, #tpu.memory_space<vmem>>, %arg5: memref<1x128xf32, #tpu.memory_space<vmem>>, %arg6: memref<16x128xbf16, #tpu.memory_space<vmem>>, %arg7: memref<1x2x128xf32, #tpu.memory_space<vmem>>) attributes {dimension_semantics = [#tpu.dimension_semantics<parallel>], iteration_bounds = array<i64: 1>, scalar_prefetch = 0 : i64, scratch_operands = 0 : i64, tpu.core_type = #tpu.core_type<tc>, window_params = [{transform_indices = @transform_0, window_bounds = array<i64: 16, 128>}, {pipeline_mode = #tpu.pipeline_mode<synchronous>, transform_indices = @transform_1, window_bounds = array<i64: 1, 128>}, {pipeline_mode = #tpu.pipeline_mode<synchronous>, transform_indices = @transform_2, window_bounds = array<i64: 1, 128>}, {pipeline_mode = #tpu.pipeline_mode<synchronous>, transform_indices = @transform_3, window_bounds = array<i64: 128, 128>}, {pipeline_mode = #tpu.pipeline_mode<synchronous>, transform_indices = @transform_4, window_bounds = array<i64: 1, 128>}, {transform_indices = @transform_5, window_bounds = array<i64: 16, 128>}, {transform_indices = @transform_6, window_bounds = array<i64: 1, 2, 128>}]} {
    %c0 = arith.constant 0 : index
    %c0_0 = arith.constant 0 : index
    %0 = vector.load %arg1[%c0, %c0_0] : memref<16x128xbf16, #tpu.memory_space<vmem>>, vector<16x128xbf16>
    %1 = arith.extf %0 : vector<16x128xbf16> to vector<16x128xf32>
    %c0_1 = arith.constant 0 : index
    %c0_2 = arith.constant 0 : index
    %2 = vector.load %arg2[%c0_1, %c0_2] : memref<1x128xf32, #tpu.memory_space<vmem>>, vector<1x128xf32>
    %3 = vector.broadcast %2 : vector<1x128xf32> to vector<16x128xf32>
    %4 = arith.mulf %1, %3 : vector<16x128xf32>
    %c0_3 = arith.constant 0 : index
    %c0_4 = arith.constant 0 : index
    %5 = vector.load %arg3[%c0_3, %c0_4] : memref<1x128xf32, #tpu.memory_space<vmem>>, vector<1x128xf32>
    %6 = vector.broadcast %5 : vector<1x128xf32> to vector<16x128xf32>
    %7 = arith.addf %4, %6 : vector<16x128xf32>
    %cst = arith.constant 0.000000e+00 : f32
    %8 = vector.broadcast %cst : f32 to vector<16x128xf32>
    %9 = arith.maximumf %7, %8 : vector<16x128xf32>
    %10 = arith.truncf %9 : vector<16x128xf32> to vector<16x128xbf16>
    %c0_5 = arith.constant 0 : index
    %c0_6 = arith.constant 0 : index
    %11 = vector.load %arg4[%c0_5, %c0_6] : memref<128x128xbf16, #tpu.memory_space<vmem>>, vector<128x128xbf16>
    %cst_7 = arith.constant dense<0.000000e+00> : vector<16x128xf32>
    %12 = tpu.matmul %10, %11, %cst_7 {dimension_numbers = #tpu.dot_dimension_numbers<[1], [0], [0], [1], [0, 0, 1, 1], [], []>} : vector<16x128xbf16>, vector<128x128xbf16>, vector<16x128xf32> -> vector<16x128xf32>
    %c0_8 = arith.constant 0 : index
    %c0_9 = arith.constant 0 : index
    %13 = vector.load %arg5[%c0_8, %c0_9] : memref<1x128xf32, #tpu.memory_space<vmem>>, vector<1x128xf32>
    %14 = vector.broadcast %13 : vector<1x128xf32> to vector<16x128xf32>
    %15 = arith.addf %12, %14 : vector<16x128xf32>
    %16 = arith.truncf %15 : vector<16x128xf32> to vector<16x128xbf16>
    %17 = arith.extf %16 : vector<16x128xbf16> to vector<16x128xf32>
    %cst_10 = arith.constant dense<0.000000e+00> : vector<128xf32>
    %18 = vector.multi_reduction <add>, %17, %cst_10 [0] : vector<16x128xf32> to vector<128xf32>
    %19 = vector.shape_cast %18 : vector<128xf32> to vector<1x128xf32>
    %20 = arith.mulf %17, %17 : vector<16x128xf32>
    %cst_11 = arith.constant dense<0.000000e+00> : vector<128xf32>
    %21 = vector.multi_reduction <add>, %20, %cst_11 [0] : vector<16x128xf32> to vector<128xf32>
    %22 = vector.shape_cast %21 : vector<128xf32> to vector<1x128xf32>
    %23 = tpu.concatenate %19, %22 in 0 : vector<1x128xf32>, vector<1x128xf32> -> vector<2x128xf32>
    %c0_12 = arith.constant 0 : index
    %c0_13 = arith.constant 0 : index
    %c0_14 = arith.constant 0 : index
    %24 = vector.load %arg7[%c0_12, %c0_13, %c0_14] : memref<1x2x128xf32, #tpu.memory_space<vmem>>, vector<1x2x128xf32>
    %25 = vector.shape_cast %24 : vector<1x2x128xf32> to vector<2x128xf32>
    %26 = vector.shape_cast %23 : vector<2x128xf32> to vector<1x2x128xf32>
    tpu.vector_store %arg7[%c0_12, %c0_13, %c0_14], %26 {strides = array<i32>} : memref<1x2x128xf32, #tpu.memory_space<vmem>>, vector<1x2x128xf32>,
    %27 = arith.truncf %15 : vector<16x128xf32> to vector<16x128xbf16>
    %c0_15 = arith.constant 0 : index
    %c0_16 = arith.constant 0 : index
    %28 = vector.load %arg6[%c0_15, %c0_16] : memref<16x128xbf16, #tpu.memory_space<vmem>>, vector<16x128xbf16>
    tpu.vector_store %arg6[%c0_15, %c0_16], %27 {strides = array<i32>} : memref<16x128xbf16, #tpu.memory_space<vmem>>, vector<16x128xbf16>,
    return
  }
  func.func @transform_0(%arg0: i32) -> (i32, i32) {
    %c0_i32 = arith.constant 0 : i32
    %c0_i32_0 = arith.constant 0 : i32
    return %arg0, %c0_i32 : i32, i32
  }
  func.func @transform_1(%arg0: i32) -> (i32, i32) {
    %c0_i32 = arith.constant 0 : i32
    %c0_i32_0 = arith.constant 0 : i32
    %c0_i32_1 = arith.constant 0 : i32
    return %c0_i32, %c0_i32_0 : i32, i32
  }
  func.func @transform_2(%arg0: i32) -> (i32, i32) {
    %c0_i32 = arith.constant 0 : i32
    %c0_i32_0 = arith.constant 0 : i32
    %c0_i32_1 = arith.constant 0 : i32
    return %c0_i32, %c0_i32_0 : i32, i32
  }
  func.func @transform_3(%arg0: i32) -> (i32, i32) {
    %c0_i32 = arith.constant 0 : i32
    %c0_i32_0 = arith.constant 0 : i32
    %c0_i32_1 = arith.constant 0 : i32
    return %c0_i32, %c0_i32_0 : i32, i32
  }
  func.func @transform_4(%arg0: i32) -> (i32, i32) {
    %c0_i32 = arith.constant 0 : i32
    %c0_i32_0 = arith.constant 0 : i32
    %c0_i32_1 = arith.constant 0 : i32
    return %c0_i32, %c0_i32_0 : i32, i32
  }
  func.func @transform_5(%arg0: i32) -> (i32, i32) {
    %c0_i32 = arith.constant 0 : i32
    %c0_i32_0 = arith.constant 0 : i32
    return %arg0, %c0_i32 : i32, i32
  }
  func.func @transform_6(%arg0: i32) -> (i32, i32, i32) {
    %c0_i32 = arith.constant 0 : i32
    %c0_i32_0 = arith.constant 0 : i32
    %c0_i32_1 = arith.constant 0 : i32
    return %arg0, %c0_i32, %c0_i32_0 : i32, i32, i32
  }
}

module attributes {stable_mosaic.version = 11 : i64} {
  func.func @_bn2_relu_kernel(%arg0: i32, %arg1: memref<16x128xbf16, #tpu.memory_space<vmem>>, %arg2: memref<1x128xf32, #tpu.memory_space<vmem>>, %arg3: memref<1x128xf32, #tpu.memory_space<vmem>>, %arg4: memref<16x128xf32, #tpu.memory_space<vmem>>) attributes {dimension_semantics = [#tpu.dimension_semantics<parallel>], iteration_bounds = array<i64: 1>, scalar_prefetch = 0 : i64, scratch_operands = 0 : i64, tpu.core_type = #tpu.core_type<tc>, window_params = [{transform_indices = @transform_0, window_bounds = array<i64: 16, 128>}, {pipeline_mode = #tpu.pipeline_mode<synchronous>, transform_indices = @transform_1, window_bounds = array<i64: 1, 128>}, {pipeline_mode = #tpu.pipeline_mode<synchronous>, transform_indices = @transform_2, window_bounds = array<i64: 1, 128>}, {transform_indices = @transform_3, window_bounds = array<i64: 16, 128>}]} {
    %c0 = arith.constant 0 : index
    %c0_0 = arith.constant 0 : index
    %0 = vector.load %arg1[%c0, %c0_0] : memref<16x128xbf16, #tpu.memory_space<vmem>>, vector<16x128xbf16>
    %1 = arith.extf %0 : vector<16x128xbf16> to vector<16x128xf32>
    %c0_1 = arith.constant 0 : index
    %c0_2 = arith.constant 0 : index
    %2 = vector.load %arg2[%c0_1, %c0_2] : memref<1x128xf32, #tpu.memory_space<vmem>>, vector<1x128xf32>
    %3 = vector.broadcast %2 : vector<1x128xf32> to vector<16x128xf32>
    %4 = arith.mulf %1, %3 : vector<16x128xf32>
    %c0_3 = arith.constant 0 : index
    %c0_4 = arith.constant 0 : index
    %5 = vector.load %arg3[%c0_3, %c0_4] : memref<1x128xf32, #tpu.memory_space<vmem>>, vector<1x128xf32>
    %6 = vector.broadcast %5 : vector<1x128xf32> to vector<16x128xf32>
    %7 = arith.addf %4, %6 : vector<16x128xf32>
    %cst = arith.constant 0.000000e+00 : f32
    %8 = vector.broadcast %cst : f32 to vector<16x128xf32>
    %9 = arith.maximumf %7, %8 : vector<16x128xf32>
    %c0_5 = arith.constant 0 : index
    %c0_6 = arith.constant 0 : index
    %10 = vector.load %arg4[%c0_5, %c0_6] : memref<16x128xf32, #tpu.memory_space<vmem>>, vector<16x128xf32>
    tpu.vector_store %arg4[%c0_5, %c0_6], %9 {strides = array<i32>} : memref<16x128xf32, #tpu.memory_space<vmem>>, vector<16x128xf32>,
    return
  }
  func.func @transform_0(%arg0: i32) -> (i32, i32) {
    %c0_i32 = arith.constant 0 : i32
    %c0_i32_0 = arith.constant 0 : i32
    return %arg0, %c0_i32 : i32, i32
  }
  func.func @transform_1(%arg0: i32) -> (i32, i32) {
    %c0_i32 = arith.constant 0 : i32
    %c0_i32_0 = arith.constant 0 : i32
    %c0_i32_1 = arith.constant 0 : i32
    return %c0_i32, %c0_i32_0 : i32, i32
  }
  func.func @transform_2(%arg0: i32) -> (i32, i32) {
    %c0_i32 = arith.constant 0 : i32
    %c0_i32_0 = arith.constant 0 : i32
    %c0_i32_1 = arith.constant 0 : i32
    return %c0_i32, %c0_i32_0 : i32, i32
  }
  func.func @transform_3(%arg0: i32) -> (i32, i32) {
    %c0_i32 = arith.constant 0 : i32
    %c0_i32_0 = arith.constant 0 : i32
    return %arg0, %c0_i32 : i32, i32
  }
}

</mosaic_0001>

<bundles_post_ra>
// kernel: layer_gin_forward.5
= control target key start
LH: loop header
LB: loop body
LE: loop exit
PB: predicated region body
PF: predicated region fallthrough
CT: control target
= control target key end

     0   :  { %s79_s0 = inlined_call_operand.vmem [shape: bf16[16,128], index: 0, kind: input, shape index: {}]   ;;  %s80_s1 = inlined_call_operand.vmem [shape: f32[1,128], index: 1, kind: input, shape index: {}]   ;;  %s81_s2 = inlined_call_operand.vmem [shape: f32[1,128], index: 2, kind: input, shape index: {}]   ;;  %s82_s3 = inlined_call_operand.vmem [shape: f32[16,128], index: 3, kind: output, shape index: {}]  }
   0x1   :  { %v39_v0 = vld [vmem:[%s79_s0] sm:$0xff]  }
   0x2   :  { %v42_v1 = vld [vmem:[%s80_s1] ss:$0 sm:$0xff]  ;;  %v40_v2 = vunpack.c.l.bf16 %v39_v0  ;;  %v41_v4 = vunpack.c.h.bf16 %v39_v0 }
   0x3   :  { %v43_v3 = vld [vmem:[%s81_s2] ss:$0 sm:$0xff] }
   0x4   :  { %v22_v5 = vmul.f32 %v42_v1, %v40_v2  ;;  %v23_v6 = vmul.f32 %v42_v1, %v41_v4 }
   0x6   :  { %v28_v7 = vadd.f32 %v43_v3, %v22_v5  ;;  %v29_v8 = vadd.f32 %v43_v3, %v23_v6 }
   0x8   :  { %v30_v9 = vmax.f32 %v28_v7, 0.0  ;;  %v31_v10 = vmax.f32 %v29_v8, 0.0 }
   0xa   :  { %32 = vst [vmem:[%s82_s3] sm:$0xff] %v30_v9 }
   0xb   :  { %33 = vst [vmem:[%s82_s3 + $0x8] sm:$0xff] %v31_v10 }

// kernel: layer_gin_forward.4
= control target key start
LH: loop header
LB: loop body
LE: loop exit
PB: predicated region body
PF: predicated region fallthrough
CT: control target
= control target key end

     0   :  { %vm143_vm0 = vcmask 1040384   ;;  %s285_s3 = inlined_call_operand.vmem [shape: bf16[128,128], index: 3, kind: input, shape index: {}]   ;;  %s286_s1 = inlined_call_operand.vmem [shape: f32[1,128], index: 1, kind: input, shape index: {}]   ;;  %s287_s2 = inlined_call_operand.vmem [shape: f32[1,128], index: 2, kind: input, shape index: {}]   ;;  %s288_s4 = inlined_call_operand.vmem [shape: f32[1,128], index: 4, kind: input, shape index: {}]   ;;  %s289_s0 = inlined_call_operand.vmem [shape: bf16[16,128], index: 0, kind: input, shape index: {}]   ;;  %s290_s5 = inlined_call_operand.vmem [shape: bf16[16,128], index: 5, kind: output, shape index: {0}]   ;;  %s291_s6 = inlined_call_operand.vmem [shape: f32[1,2,128], index: 6, kind: output, shape index: {1}]  }
   0x1   :  { %v195_v0 = vld [vmem:[%s285_s3 + $0x38] sm:$0xff]  ;;  %v194_v1 = vld [vmem:[%s285_s3 + $0x30] sm:$0xff]  ;;  %v193_v2 = vld [vmem:[%s285_s3 + $0x28] sm:$0xff] }
   0x2   :  { %109 = vmatpush.bf16.msra.mxu0 %v195_v0  ;;  %v192_v3 = vld [vmem:[%s285_s3 + $0x20] sm:$0xff]  ;;  %v191_v8 = vld [vmem:[%s285_s3 + $0x18] sm:$0xff]  ;;  %v190_v12 = vld [vmem:[%s285_s3 + $0x10] sm:$0xff] }
   0x3   :  { %v197_v4 = vld [vmem:[%s289_s0] sm:$0xff]   ;;  %v189_v15 = vld [vmem:[%s285_s3 + $0x8] sm:$0xff] }
   0x4   :  { %v198_v5 = vunpack.c.l.bf16 %v197_v4  ;;  %v199_v6 = vunpack.c.h.bf16 %v197_v4  ;;  %v205_v7 = vld [vmem:[%s286_s1] ss:$0 sm:$0xff] }
   0x5   :  { %v206_v11 = vld [vmem:[%s287_s2] ss:$0 sm:$0xff] }
   0x6   :  { %110 = vmatpush.bf16.msra.mxu0 %v194_v1  ;;  %v30_v9 = vmul.f32 %v205_v7, %v198_v5  ;;  %v31_v10 = vmul.f32 %v205_v7, %v199_v6  ;;  %v188_v18 = vld [vmem:[%s285_s3] sm:$0xff] }
   0x7   :  { %v207_v20 = vld [vmem:[%s288_s4] ss:$0 sm:$0xff] }
   0x8   :  { %v36_v13 = vadd.f32 %v206_v11, %v30_v9  ;;  %v37_v14 = vadd.f32 %v206_v11, %v31_v10 }
   0xa   :  { %111 = vmatpush.bf16.msra.mxu0 %v193_v2  ;;  %v38_v16 = vmax.f32 %v36_v13, 0.0  ;;  %v39_v17 = vmax.f32 %v37_v14, 0.0 }
   0xc   :  { %v40_v19 = vpack.c.bf16 %v39_v17, %v38_v16 }
   0xe   :  { %112 = vmatpush.bf16.msra.mxu0 %v192_v3 }
  0x12   :  { %113 = vmatpush.bf16.msra.mxu0 %v191_v8 }
  0x16   :  { %114 = vmatpush.bf16.msra.mxu0 %v190_v12 }
  0x1a   :  { %115 = vmatpush.bf16.msra.mxu0 %v189_v15 }
  0x1e   :  { %116 = vmatpush.bf16.msra.mxu0 %v188_v18 }
  0x21   :  { %117 = vmatmul.bf16.vlgmr.msra.gmra.mxu0 %v40_v19 }
  0x9e   :  { %v118_v21 = vpop.f32.mrf.mxu0 }
  0x9f   :  { %v119_v22 = vadd.f32 %v207_v20, %v118_v21 }
  0xa1   :  { %v123_v23 = vpack.c.bf16 %v119_v22, %v119_v22 }
  0xa3   :  { %v125_v26 = vunpack.c.l.bf16 %v123_v23 }
  0xa5   :  { %v134_v30 = vmul.f32 %v125_v26, %v125_v26 }
  0xa6   :  { %v120_v24 = vpop.f32.mrf.mxu0 }
  0xa7   :  { %v121_v25 = vadd.f32 %v207_v20, %v120_v24 }
  0xa9   :  { %v124_v27 = vpack.c.bf16 %v121_v25, %v121_v25  ;;  %v203_v28 = vpack.c.bf16 %v121_v25, %v119_v22 }
  0xab   :  { %v126_v29 = vunpack.c.l.bf16 %v124_v27  ;;  %204 = vst [vmem:[%s290_s5] sm:$0xff] %v203_v28  }
  0xad   :  { %v127_v31 = vadd.f32 %v126_v29, %v125_v26  ;;  %v135_v32 = vmul.f32 %v126_v29, %v126_v29 }
  0xaf   :  { %v128_v33 = vrot.slane %v127_v31, 4  ;;  %v136_v34 = vadd.f32 %v135_v32, %v134_v30 }
  0xb1   :  { %v129_v35 = vadd.f32 %v128_v33, %v127_v31  ;;  %v137_v36 = vrot.slane %v136_v34, 4 }
  0xb3   :  { %v130_v37 = vrot.slane %v129_v35, 2  ;;  %v138_v38 = vadd.f32 %v137_v36, %v136_v34 }
  0xb5   :  { %v131_v39 = vadd.f32 %v130_v37, %v129_v35  ;;  %v139_v40 = vrot.slane %v138_v38, 2 }
  0xb7   :  { %v132_v41 = vrot.slane %v131_v39, 1  ;;  %v140_v42 = vadd.f32 %v139_v40, %v138_v38 }
  0xb9   :  { %v141_v43 = vrot.slane %v140_v42, 1  ;;  %v133_v44 = vadd.f32 %v132_v41, %v131_v39 }
  0xbb   :  { %v142_v45 = vadd.f32 %v141_v43, %v140_v42 }
  0xbd   :  { %v144_v46 = vsel %vm143_vm0, %v133_v44, %v142_v45 }
  0xbe   :  { %145 = vst [vmem:[%s291_s6] sm:$0x3] %v144_v46 }

// kernel: layer_gin_forward.3
= control target key start
LH: loop header
LB: loop body
LE: loop exit
PB: predicated region body
PF: predicated region fallthrough
CT: control target
= control target key end

     0   :  { %vm39_vm0 = vcmask 1043456   ;;  %vm35_vm1 = vcmask 64512   ;;  %vm178_vm2 = vcmask 1040384   ;;  %s333_s1 = inlined_call_operand.vmem [shape: bf16[2,8,128], index: 1, kind: input, shape index: {}]   ;;  %s334_s0 = inlined_call_operand.vmem [shape: bf16[2,8,8], index: 0, kind: input, shape index: {}]   ;;  %s335_s2 = inlined_call_operand.vmem [shape: bf16[128,128], index: 2, kind: input, shape index: {}]   ;;  %s336_s3 = inlined_call_operand.vmem [shape: f32[1,128], index: 3, kind: input, shape index: {}]   ;;  %s337_s4 = inlined_call_operand.vmem [shape: bf16[2,8,128], index: 4, kind: output, shape index: {0}]   ;;  %s338_s5 = inlined_call_operand.vmem [shape: f32[1,2,128], index: 5, kind: output, shape index: {1}]  }
   0x1   :  { %v33_v0 = vld [vmem:[%s333_s1] sm:$0xf]  ;;  %v34_v1 = vld [vmem:[%s333_s1 + $0x4] sm:$0xf]  ;;  %v251_v4 = vld [vmem:[%s335_s2 + $0x38] sm:$0xff] }
   0x2   :  { %v41_v2 = vsel %vm39_vm0, %v33_v0, 0  ;;  %v60_v3 = vsel %vm39_vm0, %v34_v1, 0  ;;  %v31_v5 = vld [vmem:[%s334_s0] sm:$0xf]  ;;  %v32_v6 = vld [vmem:[%s334_s0 + $0x4] sm:$0xf]  ;;  %144 = vmatpush.bf16.msra.mxu2 %v251_v4 }
   0x3   :  { %50 = vmatpush.bf16.msra.mxu0 %v41_v2  ;;  %69 = vmatpush.bf16.msra.mxu1 %v60_v3  ;;  %v250_v7 = vld [vmem:[%s335_s2 + $0x30] sm:$0xff]  ;;  %v249_v8 = vld [vmem:[%s335_s2 + $0x28] sm:$0xff]  ;;  %v248_v9 = vld [vmem:[%s335_s2 + $0x20] sm:$0xff] }
   0x4   :  { %v247_v10 = vld [vmem:[%s335_s2 + $0x18] sm:$0xff]  ;;  %v246_v11 = vld [vmem:[%s335_s2 + $0x10] sm:$0xff]  ;;  %v245_v12 = vld [vmem:[%s335_s2 + $0x8] sm:$0xff] }
   0x5   :  { %v244_v13 = vld [vmem:[%s335_s2] sm:$0xff] }
   0x6   :  { %210 = vmatmul.msk.bf16.vlgmr.msra.gmra.mxu0 %vm35_vm1, %v31_v5  ;;  %211 = vmatmul.msk.bf16.vlgmr.msra.gmra.mxu1 %vm35_vm1, %v32_v6  ;;  %v257_v19 = vld [vmem:[%s336_s3] ss:$0 sm:$0xff] }
   0x7   :  { %145 = vmatpush.bf16.msra.mxu2 %v250_v7 }
   0xb   :  { %146 = vmatpush.bf16.msra.mxu2 %v249_v8 }
   0xf   :  { %147 = vmatpush.bf16.msra.mxu2 %v248_v9 }
  0x13   :  { %148 = vmatpush.bf16.msra.mxu2 %v247_v10 }
  0x17   :  { %149 = vmatpush.bf16.msra.mxu2 %v246_v11 }
  0x1b   :  { %150 = vmatpush.bf16.msra.mxu2 %v245_v12 }
  0x1f   :  { %151 = vmatpush.bf16.msra.mxu2 %v244_v13 }
  0x83   :  { %v52_v14 = vpop.f32.mrf.mxu0  ;;  %v71_v15 = vpop.f32.mrf.mxu1 }
  0x84   :  { %v75_v16 = vpack.c.bf16 %v71_v15, %v52_v14 }
  0x86   :  { %152 = vmatmul.bf16.vlgmr.msra.gmra.mxu2 %v75_v16 }
  0x8b   :  { %v54_v17 = vpop.f32.mrf.mxu0  ;;  %v73_v18 = vpop.f32.mrf.mxu1 }
 0x109   :  { %v153_v20 = vpop.f32.mrf.mxu2 }
 0x10a   :  { %v154_v21 = vadd.f32 %v257_v19, %v153_v20 }
 0x10c   :  { %v158_v22 = vpack.c.bf16 %v154_v21, %v154_v21 }
 0x10e   :  { %v160_v25 = vunpack.c.l.bf16 %v158_v22 }
 0x110   :  { %v169_v29 = vmul.f32 %v160_v25, %v160_v25 }
 0x111   :  { %v155_v23 = vpop.f32.mrf.mxu2 }
 0x112   :  { %v156_v24 = vadd.f32 %v257_v19, %v155_v23 }
 0x114   :  { %v159_v26 = vpack.c.bf16 %v156_v24, %v156_v24  ;;  %v255_v27 = vpack.c.bf16 %v156_v24, %v154_v21 }
 0x116   :  { %v161_v28 = vunpack.c.l.bf16 %v159_v26  ;;  %256 = vst [vmem:[%s337_s4] sm:$0xff] %v255_v27  }
 0x118   :  { %v162_v30 = vadd.f32 %v161_v28, %v160_v25  ;;  %v170_v31 = vmul.f32 %v161_v28, %v161_v28 }
 0x11a   :  { %v163_v32 = vrot.slane %v162_v30, 4  ;;  %v171_v33 = vadd.f32 %v170_v31, %v169_v29 }
 0x11c   :  { %v164_v34 = vadd.f32 %v163_v32, %v162_v30  ;;  %v172_v35 = vrot.slane %v171_v33, 4 }
 0x11e   :  { %v165_v36 = vrot.slane %v164_v34, 2  ;;  %v173_v37 = vadd.f32 %v172_v35, %v171_v33 }
 0x120   :  { %v166_v38 = vadd.f32 %v165_v36, %v164_v34  ;;  %v174_v39 = vrot.slane %v173_v37, 2 }
 0x122   :  { %v167_v40 = vrot.slane %v166_v38, 1  ;;  %v175_v41 = vadd.f32 %v174_v39, %v173_v37 }
 0x124   :  { %v176_v42 = vrot.slane %v175_v41, 1  ;;  %v168_v43 = vadd.f32 %v167_v40, %v166_v38 }
 0x126   :  { %v177_v44 = vadd.f32 %v176_v42, %v175_v41 }
 0x128   :  { %v179_v45 = vsel %vm178_vm2, %v168_v43, %v177_v44 }
 0x129   :  { %180 = vst [vmem:[%s338_s5] sm:$0x3] %v179_v45 }

</bundles_post_ra>
